<compile_context>
chip_gen: v6e
topology: v6e:2x2x1
jax: 0.10.0
libtpu: 0.0.40
codegen_flags: <defaults>
</compile_context>

<pallas_src>
import functools

import jax
import jax.numpy as jnp
import numpy as np
from jax.experimental import pallas as pl
from jax.experimental.pallas import tpu as pltpu

INF = 1000000000.0


def _round_up(x, m):
    return (x + m - 1) // m * m


def _choose_s_tile(s, max_tile=256):
    """Largest multiple-of-128 divisor of `s` that is <= max_tile, else full s."""
    for ts in range(max_tile, 127, -128):
        if s % ts == 0:
            return ts
    # TODO(synk): for large S not divisible by 128, pad S (and mask the padded
    # columns) so the conf output can still be tiled with lane-aligned blocks.
    return s


def _chip_config():
    """(max S tile, vmem_limit_bytes or None) chosen from the local TPU."""
    try:
        info = pltpu.get_tpu_info()
        vmem = int(getattr(info, "vmem_capacity_bytes", 0) or 0)
    except Exception:
        vmem = 0
    if vmem <= 0:
        return 256, None                       # unknown chip: compiler defaults
    if vmem >= 96 * 1024 * 1024:               # v5e / v6e class (128 MiB VMEM)
        return 512, int(vmem * 0.75)
    return 256, int(vmem * 0.75)               # v7x class (64 MiB per TC)


# ----------------------------------------------------------------------------
# Pass 1: exact row (over S) softmax stats via an online max / sum-of-exp.
# q / k arrive pre-scaled and already bf16.
# ----------------------------------------------------------------------------
def _row_stats_kernel(*refs, has_mask):
    if has_mask:
        f0_ref, f1_ref, m0_ref, m1_ref, m_ref, l_ref = refs
    else:
        f0_ref, f1_ref, m_ref, l_ref = refs
        m0_ref = m1_ref = None

    s_idx = pl.program_id(1)

    @pl.when(s_idx == 0)
    def _init():
        m_ref[...] = jnp.full(m_ref.shape, -INF, jnp.float32)
        l_ref[...] = jnp.zeros(l_ref.shape, jnp.float32)

    sim = jax.lax.dot_general(f0_ref[0], f1_ref[0], (((1,), (1,)), ((), ())),
                              preferred_element_type=jnp.float32)      # [L, TS]
    if has_mask:
        mask2d = (m0_ref[0] > 0.5) & (m1_ref[0] > 0.5)                 # [L,1]&[1,TS]
        sim = jnp.where(mask2d, sim, -INF)

    m_prev = m_ref[0]                                                  # [L, 1]
    m_new = jnp.maximum(m_prev, jnp.max(sim, axis=1, keepdims=True))
    alpha = jnp.exp(m_prev - m_new)
    l_ref[0] = l_ref[0] * alpha + jnp.sum(jnp.exp(sim - m_new), axis=1,
                                          keepdims=True)
    m_ref[0] = m_new


# ----------------------------------------------------------------------------
# Pass 2: conf tiles (softmax_L * softmax_S) + running row max / argmax.
# Only used when the full conf matrix is materialized.
# ----------------------------------------------------------------------------
def _conf_kernel(*refs, has_mask, s_tile):
    idx = 0
    f0_ref = refs[idx]; idx += 1
    f1_ref = refs[idx]; idx += 1
    m0_ref = m1_ref = None
    if has_mask:
        m0_ref = refs[idx]; idx += 1
        m1_ref = refs[idx]; idx += 1
    rowmax_ref = refs[idx]; idx += 1
    rowsum_ref = refs[idx]; idx += 1
    conf_ref = refs[idx]; idx += 1
    rmax_ref = refs[idx]; idx += 1
    ridx_ref = refs[idx]; idx += 1

    s_idx = pl.program_id(1)

    @pl.when(s_idx == 0)
    def _init():
        rmax_ref[...] = jnp.full(rmax_ref.shape, -1.0, jnp.float32)
        ridx_ref[...] = jnp.zeros(ridx_ref.shape, jnp.int32)

    sim = jax.lax.dot_general(f0_ref[0], f1_ref[0], (((1,), (1,)), ((), ())),
                              preferred_element_type=jnp.float32)      # [L, TS]
    if has_mask:
        mask2d = (m0_ref[0] > 0.5) & (m1_ref[0] > 0.5)
        sim = jnp.where(mask2d, sim, -INF)

    # softmax over L: columns are complete inside one S-tile (L is resident).
    col_e = jnp.exp(sim - jnp.max(sim, axis=0, keepdims=True))         # [L, TS]
    inv_col = pl.reciprocal(jnp.sum(col_e, axis=0, keepdims=True))     # [1, TS]
    # softmax over S: use the exact precomputed row stats from pass 1.
    row_e = jnp.exp(sim - rowmax_ref[0])                               # [L, TS]
    inv_row = pl.reciprocal(rowsum_ref[0])                             # [L, 1]
    conf = (col_e * inv_col) * (row_e * inv_row)                       # [L, TS]
    conf_ref[0] = conf.astype(conf_ref.dtype)

    # running row max / argmax over S (first-occurrence tie-break, like torch).
    tile_max = jnp.max(conf, axis=1, keepdims=True)                    # [L, 1]
    lane = jax.lax.broadcasted_iota(jnp.int32, conf.shape, 1) + s_idx * s_tile
    tile_arg = jnp.min(jnp.where(conf == tile_max, lane, jnp.int32(2 ** 30)),
                       axis=1, keepdims=True)
    better = tile_max > rmax_ref[0]
    ridx_ref[0] = jnp.where(better, tile_arg, ridx_ref[0])
    rmax_ref[0] = jnp.maximum(rmax_ref[0], tile_max)


# ----------------------------------------------------------------------------
# Fused single pass for write_conf=False (deploy / selection-only).
# conf[l,s] = colsm[l,s] * exp(sim[l,s] - rowmax_l) / rowsum_l; the per-row
# positive scale does not change the argmax, so we track the running max of
# g = colsm * exp(sim - m_running), rescale stored maxima by alpha whenever the
# running row max moves, and divide by the final rowsum at the last tile.
# ----------------------------------------------------------------------------
def _fused_select_kernel(*refs, has_mask, s_tile):
    idx = 0
    f0_ref = refs[idx]; idx += 1
    f1_ref = refs[idx]; idx += 1
    m0_ref = m1_ref = None
    if has_mask:
        m0_ref = refs[idx]; idx += 1
        m1_ref = refs[idx]; idx += 1
    rmax_ref = refs[idx]; idx += 1
    ridx_ref = refs[idx]; idx += 1
    m_sc = refs[idx]; idx += 1            # running row max    [L, 1]
    l_sc = refs[idx]; idx += 1            # running row sumexp [L, 1]

    s_idx = pl.program_id(1)

    @pl.when(s_idx == 0)
    def _init():
        m_sc[...] = jnp.full(m_sc.shape, -INF, jnp.float32)
        l_sc[...] = jnp.zeros(l_sc.shape, jnp.float32)
        rmax_ref[...] = jnp.full(rmax_ref.shape, -1.0, jnp.float32)
        ridx_ref[...] = jnp.zeros(ridx_ref.shape, jnp.int32)

    sim = jax.lax.dot_general(f0_ref[0], f1_ref[0], (((1,), (1,)), ((), ())),
                              preferred_element_type=jnp.float32)      # [L, TS]
    if has_mask:
        mask2d = (m0_ref[0] > 0.5) & (m1_ref[0] > 0.5)
        sim = jnp.where(mask2d, sim, -INF)

    # exact per-tile column softmax (L fully resident).
    col_e = jnp.exp(sim - jnp.max(sim, axis=0, keepdims=True))         # [L, TS]
    colsm = col_e * pl.reciprocal(jnp.sum(col_e, axis=0, keepdims=True))

    # online row softmax stats.
    m_prev = m_sc[...]                                                 # [L, 1]
    m_new = jnp.maximum(m_prev, jnp.max(sim, axis=1, keepdims=True))
    alpha = jnp.exp(m_prev - m_new)                                    # [L, 1]
    p = jnp.exp(sim - m_new)                                           # [L, TS]
    l_sc[...] = l_sc[...] * alpha + jnp.sum(p, axis=1, keepdims=True)
    m_sc[...] = m_new

    # running (un-normalized) row max / argmax of conf.
    g = colsm * p                                                      # [L, TS]
    tile_max = jnp.max(g, axis=1, keepdims=True)                       # [L, 1]
    lane = jax.lax.broadcasted_iota(jnp.int32, g.shape, 1) + s_idx * s_tile
    tile_arg = jnp.min(jnp.where(g == tile_max, lane, jnp.int32(2 ** 30)),
                       axis=1, keepdims=True)
    prev_scaled = rmax_ref[0] * alpha
    better = tile_max > prev_scaled
    ridx_ref[0] = jnp.where(better, tile_arg, ridx_ref[0])
    rmax_ref[0] = jnp.maximum(prev_scaled, tile_max)

    @pl.when(s_idx == pl.num_programs(1) - 1)
    def _finalize():
        rmax_ref[0] = rmax_ref[0] * pl.reciprocal(l_sc[...])


# ----------------------------------------------------------------------------
# Wrapper around the pallas_calls.
# ----------------------------------------------------------------------------
def coarse_matching_conf(feat_c0, feat_c1, mask_c0=None, mask_c1=None, *,
                         temperature=0.1, s_tile=None, write_conf=True,
                         conf_dtype=jnp.bfloat16):
    """Returns (conf_matrix or None, row_max_val [N,L] f32, row_max_idx [N,L] i32)."""
    N, L, C = feat_c0.shape
    _, S, _ = feat_c1.shape
    has_mask = mask_c0 is not None

    max_tile, vmem_limit = _chip_config()
    if s_tile is None:
        s_tile = _choose_s_tile(S, max_tile)
    if S % s_tile != 0 or (s_tile % 128 != 0 and s_tile != S):
        raise ValueError(f"s_tile={s_tile} must divide S={S} and be a multiple "
                         f"of 128 (or equal to S)")
    n_s = S // s_tile

    # Fold 1/sqrt(C) * 1/sqrt(C) * 1/temperature into ONE scale on q, cast both
    # features to bf16 in the wrapper (halves DMA + resident f0 VMEM, removes
    # per-tile scale/cast VPU work), and zero-pad the contraction dim to a full
    # 128-lane multiple so the MXU runs at full width.
    scale = 1.0 / (float(C) * float(temperature))
    q = (feat_c0.astype(jnp.float32) * scale).astype(jnp.bfloat16)
    k = feat_c1.astype(jnp.bfloat16)
    Cp = max(128, _round_up(C, 128))
    if Cp != C:
        pad = [(0, 0), (0, 0), (0, Cp - C)]
        q = jnp.pad(q, pad)
        k = jnp.pad(k, pad)

    args = [q, k]
    in_specs = [
        pl.BlockSpec((1, L, Cp), lambda n, s: (n, 0, 0)),
        pl.BlockSpec((1, s_tile, Cp), lambda n, s: (n, s, 0)),
    ]
    if has_mask:
        m0 = mask_c0.astype(jnp.float32).reshape(N, L, 1)
        m1 = mask_c1.astype(jnp.float32).reshape(N, 1, S)
        args += [m0, m1]
        in_specs += [
            pl.BlockSpec((1, L, 1), lambda n, s: (n, 0, 0)),
            pl.BlockSpec((1, 1, s_tile), lambda n, s: (n, 0, s)),
        ]

    cparams = pltpu.CompilerParams(
        dimension_semantics=("parallel", "arbitrary"),
        vmem_limit_bytes=vmem_limit)

    stat_spec = pl.BlockSpec((1, L, 1), lambda n, s: (n, 0, 0))

    if not write_conf:
        # ---- fused single pass: selection stats only, no conf in HBM --------
        rmax, ridx = pl.pallas_call(
            functools.partial(_fused_select_kernel, has_mask=has_mask,
                              s_tile=s_tile),
            out_shape=(jax.ShapeDtypeStruct((N, L, 1), jnp.float32),
                       jax.ShapeDtypeStruct((N, L, 1), jnp.int32)),
            grid_spec=pltpu.PrefetchScalarGridSpec(
                num_scalar_prefetch=0, grid=(N, n_s),
                in_specs=in_specs,
                out_specs=[stat_spec, stat_spec],
                scratch_shapes=[pltpu.VMEM((L, 1), jnp.float32),
                                pltpu.VMEM((L, 1), jnp.float32)]),
            compiler_params=cparams,
        )(*args)
        return None, rmax[:, :, 0], ridx[:, :, 0]

    # ---- pass 1: row softmax stats (resident (1,L,1) accumulator outputs) ---
    row_max, row_sum = pl.pallas_call(
        functools.partial(_row_stats_kernel, has_mask=has_mask),
        out_shape=(jax.ShapeDtypeStruct((N, L, 1), jnp.float32),
                   jax.ShapeDtypeStruct((N, L, 1), jnp.float32)),
        grid_spec=pltpu.PrefetchScalarGridSpec(
            num_scalar_prefetch=0, grid=(N, n_s),
            in_specs=in_specs,
            out_specs=[stat_spec, stat_spec]),
        compiler_params=cparams,
    )(*args)

    # ---- pass 2: conf tiles + running row max / argmax -----------------------
    outs = pl.pallas_call(
        functools.partial(_conf_kernel, has_mask=has_mask, s_tile=s_tile),
        out_shape=(jax.ShapeDtypeStruct((N, L, S), conf_dtype),
                   jax.ShapeDtypeStruct((N, L, 1), jnp.float32),
                   jax.ShapeDtypeStruct((N, L, 1), jnp.int32)),
        grid_spec=pltpu.PrefetchScalarGridSpec(
            num_scalar_prefetch=0, grid=(N, n_s),
            in_specs=in_specs + [stat_spec, stat_spec],
            out_specs=[pl.BlockSpec((1, L, s_tile), lambda n, s: (n, 0, s)),
                       stat_spec, stat_spec]),
        compiler_params=cparams,
    )(*(args + [row_max, row_sum]))

    conf, rmax, ridx = outs
    return conf, rmax[:, :, 0], ridx[:, :, 0]


def coarse_matching_forward(feat_c0, feat_c1, data, mask_c0=None, mask_c1=None,
                            *, temperature=0.1, topk=8, deploy=False,
                            s_tile=None, materialize_conf=True,
                            conf_dtype=jnp.bfloat16):
    """JAX/Pallas port of CoarseMatching.forward (softmax*softmax path).

    Note: the ds_opt inference branch (exp + L1 normalize) is mathematically
    identical to softmax*softmax, so this single path covers both.
    """
    N, L, C = feat_c0.shape
    _, S, _ = feat_c1.shape

    conf_matrix, row_max_val, row_max_idx = coarse_matching_conf(
        feat_c0, feat_c1, mask_c0, mask_c1,
        temperature=temperature, s_tile=s_tile, write_conf=materialize_conf,
        conf_dtype=conf_dtype)
    if conf_matrix is not None:
        data["conf_matrix"] = conf_matrix

    if not deploy:
        # ---- coarse_matching_selection (top-k + tiny gathers, plain JAX) ----
        k = topk
        if k == -1 or k > L:
            k = L
        topk_val, topk_idx = jax.lax.top_k(row_max_val, k)             # [N, k]
        b_ids = jnp.repeat(jnp.arange(N, dtype=jnp.int32), k)          # [N*k]
        i_ids = topk_idx.reshape(-1).astype(jnp.int32)                 # [N*k]
        j_ids = row_max_idx[b_ids, i_ids]                              # [N*k]
        # conf at the row argmax is exactly the row max, so no gather over the
        # full [N,L,S] conf matrix is needed: mconf == topk_val (f32-exact).
        mconf = topk_val.reshape(-1)

        scale = data["hw0_i"][0] / data["hw0_c"][0]
        scale0 = scale * data["scale0"][b_ids] if "scale0" in data else scale
        scale1 = scale * data["scale1"][b_ids] if "scale1" in data else scale
        w0c = data["hw0_c"][1]
        w1c = data["hw1_c"][1]
        mkpts0_c = jnp.stack([i_ids % w0c, i_ids // w0c],
                             axis=1).astype(jnp.float32) * scale0
        mkpts1_c = jnp.stack([j_ids % w1c, j_ids // w1c],
                             axis=1).astype(jnp.float32) * scale1
        data.update({"mconf": mconf, "mkpts0_c": mkpts0_c, "mkpts1_c": mkpts1_c,
                     "b_ids": b_ids, "i_ids": i_ids, "j_ids": j_ids})
        # TODO(synk): compute_supervision_fine (training-only) not ported.

    return conf_matrix


def _reference_conf(feat_c0, feat_c1, mask_c0, mask_c1, temperature):
    """Pure-JAX reference mirroring the kernel's bf16 matmul numerics."""
    C = feat_c0.shape[-1]
    scale = 1.0 / (C * temperature)
    q = (feat_c0.astype(jnp.float32) * scale).astype(jnp.bfloat16)
    k = feat_c1.astype(jnp.bfloat16)
    sim = jnp.einsum("nlc,nsc->nls", q, k, preferred_element_type=jnp.float32)
    if mask_c0 is not None:
        m = (mask_c0[..., None] > 0.5) & (mask_c1[:, None, :] > 0.5)
        sim = jnp.where(m, sim, -INF)
    return jax.nn.softmax(sim, axis=1) * jax.nn.softmax(sim, axis=2)


if __name__ == "__main__":
    # Small shapes consistent with [N, L, C] / [N, S, C] coarse features; S is
    # split into two 128-wide tiles in most tests so the online-softmax path is
    # exercised (production tile widths come from _choose_s_tile / _chip_config).
    N, L, S, C = 2, 128, 256, 32
    H0c, W0c = 8, 16      # L = H0c * W0c
    H1c, W1c = 16, 16     # S = H1c * W1c
    temperature = 0.1

    key = jax.random.PRNGKey(0)
    k0, k1 = jax.random.split(key)
    feat_c0 = jax.random.normal(k0, (N, L, C), jnp.float32)
    feat_c1 = jax.random.normal(k1, (N, S, C), jnp.float32)

    # partially masked inputs to exercise the masked_fill path (incl. fully
    # masked rows / columns from padding masks)
    mask_c0 = jnp.ones((N, L), jnp.float32).at[1, -16:].set(0.0)
    mask_c1 = jnp.ones((N, S), jnp.float32).at[0, -32:].set(0.0)

    ref = _reference_conf(feat_c0, feat_c1, mask_c0, mask_c1, temperature)

    # ---- exact-path checks: f32 conf, multi-tile (masked) ----
    conf, rmax, ridx = coarse_matching_conf(
        feat_c0, feat_c1, mask_c0, mask_c1,
        temperature=temperature, s_tile=128, conf_dtype=jnp.float32)
    conf = jax.block_until_ready(conf)
    np.testing.assert_allclose(np.asarray(conf), np.asarray(ref),
                               atol=1e-5, rtol=1e-4)
    np.testing.assert_array_equal(np.asarray(rmax),
                                  np.max(np.asarray(conf), axis=2))
    np.testing.assert_array_equal(np.asarray(ridx),
                                  np.argmax(np.asarray(conf), axis=2))

    # ---- default bf16 conf (halves the HBM writeback) ----
    conf_b, rmax_b, _ = coarse_matching_conf(
        feat_c0, feat_c1, mask_c0, mask_c1,
        temperature=temperature, s_tile=128)
    assert conf_b.dtype == jnp.bfloat16
    np.testing.assert_allclose(np.asarray(conf_b).astype(np.float32),
                               np.asarray(ref), atol=8e-3, rtol=3e-2)
    np.testing.assert_allclose(np.asarray(rmax_b), np.asarray(rmax),
                               atol=1e-7, rtol=1e-6)

    # ---- unmasked variant (mask work statically compiled out), auto s_tile ----
    conf_u, _, _ = coarse_matching_conf(
        feat_c0, feat_c1, None, None, temperature=temperature,
        conf_dtype=jnp.float32)
    ref_u = _reference_conf(feat_c0, feat_c1, None, None, temperature)
    np.testing.assert_allclose(np.asarray(conf_u), np.asarray(ref_u),
                               atol=1e-5, rtol=1e-4)

    # ---- fused single-pass deploy path (never writes conf to HBM) ----
    conf_none, rmax_d, ridx_d = coarse_matching_conf(
        feat_c0, feat_c1, mask_c0, mask_c1,
        temperature=temperature, s_tile=128, write_conf=False)
    assert conf_none is None
    np.testing.assert_allclose(np.asarray(rmax_d), np.asarray(rmax),
                               atol=1e-7, rtol=1e-5)
    picked = np.take_along_axis(np.asarray(conf),
                                np.asarray(ridx_d)[..., None], axis=2)[..., 0]
    np.testing.assert_allclose(picked, np.asarray(rmax_d),
                               atol=1e-6, rtol=1e-5)

    # ---- full forward (conf + top-k selection glue) ----
    data = {"hw0_i": (64, 128), "hw1_i": (128, 128),
            "hw0_c": (H0c, W0c), "hw1_c": (H1c, W1c)}
    conf_fwd = coarse_matching_forward(
        feat_c0, feat_c1, data, mask_c0, mask_c1,
        temperature=temperature, topk=8, deploy=False)
    jax.block_until_ready(conf_fwd)
    jax.block_until_ready(data["mconf"])
    jax.block_until_ready(data["mkpts0_c"])
    jax.block_until_ready(data["mkpts1_c"])
    assert conf_fwd.dtype == jnp.bfloat16
    assert data["mkpts0_c"].shape == (N * 8, 2)

    print("KERNEL_OK")
</pallas_src>

<mosaic_0001>
module attributes {stable_mosaic.version = 11 : i64} {
  func.func @_row_stats_kernel(%arg0: i32, %arg1: i32, %arg2: memref<1x128x128xbf16, #tpu.memory_space<vmem>>, %arg3: memref<1x128x128xbf16, #tpu.memory_space<vmem>>, %arg4: memref<1x128x1xf32, #tpu.memory_space<vmem>>, %arg5: memref<1x1x128xf32, #tpu.memory_space<vmem>>, %arg6: memref<1x128x1xf32, #tpu.memory_space<vmem>>, %arg7: memref<1x128x1xf32, #tpu.memory_space<vmem>>) attributes {dimension_semantics = [#tpu.dimension_semantics<parallel>, #tpu.dimension_semantics<arbitrary>], iteration_bounds = array<i64: 2, 2>, scalar_prefetch = 0 : i64, scratch_operands = 0 : i64, tpu.core_type = #tpu.core_type<tc>, window_params = [{transform_indices = @transform_0, window_bounds = array<i64: 1, 128, 128>}, {transform_indices = @transform_1, window_bounds = array<i64: 1, 128, 128>}, {transform_indices = @transform_2, window_bounds = array<i64: 1, 128, 1>}, {transform_indices = @transform_3, window_bounds = array<i64: 1, 1, 128>}, {transform_indices = @transform_4, window_bounds = array<i64: 1, 128, 1>}, {transform_indices = @transform_5, window_bounds = array<i64: 1, 128, 1>}]} {
    %c0_i32 = arith.constant 0 : i32
    %0 = arith.cmpi eq, %arg1, %c0_i32 : i32
    %1 = arith.extui %0 : i1 to i32
    %c0_i32_0 = arith.constant 0 : i32
    %2 = arith.cmpi ne, %1, %c0_i32_0 : i32
    scf.if %2 {
      %cst_29 = arith.constant -1.000000e+09 : f32
      %43 = vector.broadcast %cst_29 : f32 to vector<1x128x1xf32>
      %c0_30 = arith.constant 0 : index
      %c0_31 = arith.constant 0 : index
      %c0_32 = arith.constant 0 : index
      %44 = vector.load %arg6[%c0_30, %c0_31, %c0_32] : memref<1x128x1xf32, #tpu.memory_space<vmem>>, vector<1x128x1xf32>
      tpu.vector_store %arg6[%c0_30, %c0_31, %c0_32], %43 {strides = array<i32>} : memref<1x128x1xf32, #tpu.memory_space<vmem>>, vector<1x128x1xf32>,
      %cst_33 = arith.constant 0.000000e+00 : f32
      %45 = vector.broadcast %cst_33 : f32 to vector<1x128x1xf32>
      %c0_34 = arith.constant 0 : index
      %c0_35 = arith.constant 0 : index
      %c0_36 = arith.constant 0 : index
      %46 = vector.load %arg7[%c0_34, %c0_35, %c0_36] : memref<1x128x1xf32, #tpu.memory_space<vmem>>, vector<1x128x1xf32>
      tpu.vector_store %arg7[%c0_34, %c0_35, %c0_36], %45 {strides = array<i32>} : memref<1x128x1xf32, #tpu.memory_space<vmem>>, vector<1x128x1xf32>,
    } else {
    }
    %c0 = arith.constant 0 : index
    %c0_1 = arith.constant 0 : index
    %c0_2 = arith.constant 0 : index
    %3 = vector.load %arg2[%c0, %c0_1, %c0_2] : memref<1x128x128xbf16, #tpu.memory_space<vmem>>, vector<1x128x128xbf16>
    %4 = vector.shape_cast %3 : vector<1x128x128xbf16> to vector<128x128xbf16>
    %c0_3 = arith.constant 0 : index
    %c0_4 = arith.constant 0 : index
    %c0_5 = arith.constant 0 : index
    %5 = vector.load %arg3[%c0_3, %c0_4, %c0_5] : memref<1x128x128xbf16, #tpu.memory_space<vmem>>, vector<1x128x128xbf16>
    %6 = vector.shape_cast %5 : vector<1x128x128xbf16> to vector<128x128xbf16>
    %cst = arith.constant dense<0.000000e+00> : vector<128x128xf32>
    %7 = tpu.matmul %4, %6, %cst {dimension_numbers = #tpu.dot_dimension_numbers<[1], [1], [0], [0], [0, 0, 1, 0], [], []>} : vector<128x128xbf16>, vector<128x128xbf16>, vector<128x128xf32> -> vector<128x128xf32>
    %c0_6 = arith.constant 0 : index
    %c0_7 = arith.constant 0 : index
    %c0_8 = arith.constant 0 : index
    %8 = vector.load %arg4[%c0_6, %c0_7, %c0_8] : memref<1x128x1xf32, #tpu.memory_space<vmem>>, vector<1x128x1xf32>
    %9 = vector.shape_cast %8 : vector<1x128x1xf32> to vector<128x1xf32>
    %cst_9 = arith.constant 5.000000e-01 : f32
    %10 = vector.broadcast %cst_9 : f32 to vector<128x1xf32>
    %11 = arith.cmpf ogt, %9, %10 : vector<128x1xf32>
    %c0_10 = arith.constant 0 : index
    %c0_11 = arith.constant 0 : index
    %c0_12 = arith.constant 0 : index
    %12 = vector.load %arg5[%c0_10, %c0_11, %c0_12] : memref<1x1x128xf32, #tpu.memory_space<vmem>>, vector<1x1x128xf32>
    %13 = vector.shape_cast %12 : vector<1x1x128xf32> to vector<1x128xf32>
    %cst_13 = arith.constant 5.000000e-01 : f32
    %14 = vector.broadcast %cst_13 : f32 to vector<1x128xf32>
    %15 = arith.cmpf ogt, %13, %14 : vector<1x128xf32>
    %16 = vector.broadcast %11 : vector<128x1xi1> to vector<128x128xi1>
    %17 = vector.broadcast %15 : vector<1x128xi1> to vector<128x128xi1>
    %18 = arith.andi %16, %17 : vector<128x128xi1>
    %cst_14 = arith.constant -1.000000e+09 : f32
    %19 = vector.broadcast %cst_14 : f32 to vector<128x128xf32>
    %20 = arith.select %18, %7, %19 : vector<128x128xi1>, vector<128x128xf32>
    %c0_15 = arith.constant 0 : index
    %c0_16 = arith.constant 0 : index
    %c0_17 = arith.constant 0 : index
    %21 = vector.load %arg6[%c0_15, %c0_16, %c0_17] : memref<1x128x1xf32, #tpu.memory_space<vmem>>, vector<1x128x1xf32>
    %22 = vector.shape_cast %21 : vector<1x128x1xf32> to vector<128x1xf32>
    %cst_18 = arith.constant dense<0xFF800000> : vector<128xf32>
    %23 = vector.multi_reduction <maximumf>, %20, %cst_18 [1] : vector<128x128xf32> to vector<128xf32>
    %24 = vector.shape_cast %23 : vector<128xf32> to vector<128x1xf32>
    %25 = arith.maximumf %22, %24 : vector<128x1xf32>
    %26 = arith.subf %22, %25 : vector<128x1xf32>
    %27 = math.exp %26 : vector<128x1xf32>
    %c0_19 = arith.constant 0 : index
    %c0_20 = arith.constant 0 : index
    %c0_21 = arith.constant 0 : index
    %28 = vector.load %arg7[%c0_19, %c0_20, %c0_21] : memref<1x128x1xf32, #tpu.memory_space<vmem>>, vector<1x128x1xf32>
    %29 = vector.shape_cast %28 : vector<1x128x1xf32> to vector<128x1xf32>
    %30 = arith.mulf %29, %27 : vector<128x1xf32>
    %31 = vector.broadcast %25 : vector<128x1xf32> to vector<128x128xf32>
    %32 = arith.subf %20, %31 : vector<128x128xf32>
    %33 = math.exp %32 : vector<128x128xf32>
    %cst_22 = arith.constant dense<0.000000e+00> : vector<128xf32>
    %34 = vector.multi_reduction <add>, %33, %cst_22 [1] : vector<128x128xf32> to vector<128xf32>
    %35 = vector.shape_cast %34 : vector<128xf32> to vector<128x1xf32>
    %36 = arith.addf %30, %35 : vector<128x1xf32>
    %c0_23 = arith.constant 0 : index
    %c0_24 = arith.constant 0 : index
    %c0_25 = arith.constant 0 : index
    %37 = vector.load %arg7[%c0_23, %c0_24, %c0_25] : memref<1x128x1xf32, #tpu.memory_space<vmem>>, vector<1x128x1xf32>
    %38 = vector.shape_cast %37 : vector<1x128x1xf32> to vector<128x1xf32>
    %39 = vector.shape_cast %36 : vector<128x1xf32> to vector<1x128x1xf32>
    tpu.vector_store %arg7[%c0_23, %c0_24, %c0_25], %39 {strides = array<i32>} : memref<1x128x1xf32, #tpu.memory_space<vmem>>, vector<1x128x1xf32>,
    %c0_26 = arith.constant 0 : index
    %c0_27 = arith.constant 0 : index
    %c0_28 = arith.constant 0 : index
    %40 = vector.load %arg6[%c0_26, %c0_27, %c0_28] : memref<1x128x1xf32, #tpu.memory_space<vmem>>, vector<1x128x1xf32>
    %41 = vector.shape_cast %40 : vector<1x128x1xf32> to vector<128x1xf32>
    %42 = vector.shape_cast %25 : vector<128x1xf32> to vector<1x128x1xf32>
    tpu.vector_store %arg6[%c0_26, %c0_27, %c0_28], %42 {strides = array<i32>} : memref<1x128x1xf32, #tpu.memory_space<vmem>>, vector<1x128x1xf32>,
    return
  }
  func.func @transform_0(%arg0: i32, %arg1: i32) -> (i32, i32, i32) {
    %c0_i32 = arith.constant 0 : i32
    %c0_i32_0 = arith.constant 0 : i32
    %c0_i32_1 = arith.constant 0 : i32
    return %arg0, %c0_i32, %c0_i32_0 : i32, i32, i32
  }
  func.func @transform_1(%arg0: i32, %arg1: i32) -> (i32, i32, i32) {
    %c0_i32 = arith.constant 0 : i32
    %c0_i32_0 = arith.constant 0 : i32
    return %arg0, %arg1, %c0_i32 : i32, i32, i32
  }
  func.func @transform_2(%arg0: i32, %arg1: i32) -> (i32, i32, i32) {
    %c0_i32 = arith.constant 0 : i32
    %c0_i32_0 = arith.constant 0 : i32
    %c0_i32_1 = arith.constant 0 : i32
    return %arg0, %c0_i32, %c0_i32_0 : i32, i32, i32
  }
  func.func @transform_3(%arg0: i32, %arg1: i32) -> (i32, i32, i32) {
    %c0_i32 = arith.constant 0 : i32
    %c0_i32_0 = arith.constant 0 : i32
    return %arg0, %c0_i32, %arg1 : i32, i32, i32
  }
  func.func @transform_4(%arg0: i32, %arg1: i32) -> (i32, i32, i32) {
    %c0_i32 = arith.constant 0 : i32
    %c0_i32_0 = arith.constant 0 : i32
    %c0_i32_1 = arith.constant 0 : i32
    return %arg0, %c0_i32, %c0_i32_0 : i32, i32, i32
  }
  func.func @transform_5(%arg0: i32, %arg1: i32) -> (i32, i32, i32) {
    %c0_i32 = arith.constant 0 : i32
    %c0_i32_0 = arith.constant 0 : i32
    %c0_i32_1 = arith.constant 0 : i32
    return %arg0, %c0_i32, %c0_i32_0 : i32, i32, i32
  }
}

</mosaic_0001>

<bundles_post_ra>
// kernel: tpu_custom_call.1
= control target key start
LH: loop header
LB: loop body
LE: loop exit
PB: predicated region body
PF: predicated region fallthrough
CT: control target
= control target key end

     0   :  { %s2332_s0 = inlined_call_operand.hbm [shape: bf16[2,128,128], index: 0, kind: input, shape index: {}]   ;;  %s2333_s1 = inlined_call_operand.vmem [shape: bf16[2,256,128], index: 1, kind: input, shape index: {}]   ;;  %s2334_s2 = inlined_call_operand.vmem [shape: f32[2,128,1], index: 2, kind: input, shape index: {}]   ;;  %s2335_s3 = inlined_call_operand.vmem [shape: f32[2,1,256], index: 3, kind: input, shape index: {}]   ;;  %s2336_s4 = inlined_call_operand.vmem [shape: f32[2,128,1], index: 4, kind: output, shape index: {0}]   ;;  %s2337_s5 = inlined_call_operand.vmem [shape: f32[2,128,1], index: 5, kind: output, shape index: {1}]  }
   0x1   :  { %2339 = sst [smem:[#allocation7_spill]] %s2332_s0 }
   0x2   :  { %11 = vsyncpa [#allocation3], 0 }
   0x3   :  { %13 = vsyncpa [#allocation3 + $0x1], 0  ;;  %s1674_s18 = smov 0   ;;  %s1676_s19 = smov 0  }
   0x4   :  { %s1678_s20 = smov 0   ;;  %s1680_s21 = smov 0  }
   0x5   :  { %s1682_s22 = smov 0   ;;  %s1684_s23 = smov 0  }
   0x6   :  { %s1686_s24 = smov 0   ;;  %s1688_s25 = smov 0  }
   0x7 LB: > { %s1278_s26 = sadd.s32 4294967295, %s1636_s25   ;;  %s28_s27 = sadd.s32 1, %s1628_s23  ;;  %s1636_s25 = sphi %s1688_s25, %s19_s25   ;;  %s1632_s24 = sphi %s1686_s24, %s2369_s24   ;;  %s1628_s23 = sphi %s1684_s23, %s2368_s23   ;;  %s1624_s22 = sphi %s1682_s22, %s2367_s22   ;;  %s1620_s21 = sphi %s1680_s21, %s2366_s21   ;;  %s1616_s20 = sphi %s1678_s20, %s2365_s20   ;;  %s1612_s19 = sphi %s1676_s19, %s2364_s19   ;;  %s1608_s18 = sphi %s1674_s18, %s2363_s18  }
   0x8   : > { %p29_p0 = scmp.ge.s32.totalorder %s28_s27, 2  ;;  %s31_s28 = sadd.s32 1, %s1632_s24 }
   0x9   : > { %s38_s29 = sadd.s32 1, %s1616_s20  ;;  %p45_p1 = scmp.ne.s32.totalorder %s1616_s20, %s1612_s19 }
   0xa   : > { %s2371_s27 = smov (%p29_p0, %s28_s27), 0  ;;  %s2373_s28 = smov (!%p29_p0, %s31_s28), %s1632_s24 }
   0xb   : > { %2340 = sst [smem:[#allocation5_spill]] %s2371_s27  ;;  %p46_p2 = scmp.eq.s32.totalorder %s1636_s25, 0 }
   0xc   : > { %p51_p3 = scmp.ne.s32.totalorder %s1612_s19, %s1608_s18  ;;  %p33_p4 = scmp.ge.s32.totalorder %s2373_s28, 2 }
   0xd   : > { %p52_p5 = scmp.eq.s32.totalorder %s1278_s26, 0  ;;  %p1723_p6 = por %p46_p2, %p45_p1 }
   0xe   : > { %s2375_s28 = smov (%p33_p4, %s2373_s28), 0  ;;  %p1390_p8 = scmp.lt.s32.totalorder %s1636_s25, 4 }
   0xf   : > { %2342 = sst [smem:[#allocation6_spill]] %s2375_s28  ;;  %p1729_p7 = por %p52_p5, %p51_p3 }
  0x10   : > { %s35_s7 = ssub.s32 %s1632_s24, %s2375_s28  ;;  %s209_s8 = sand.u32 1, %s1616_s20  }
  0x11   : > { %p36_p9 = scmp.eq.s32.totalorder %s35_s7, 0  ;;  %s1282_s9 = sshll.u32 %s209_s8, 6 }
  0x12   : > { %s1316_s10 = sshll.u32 %s1632_s24, 10  ;;  %s2344_s0 = sld [smem:[#allocation7_spill]] }
  0x13   : > { %s1739_s11 = scalar_select %p36_p9, %s1616_s20, %s38_s29  }
  0x14   : > { %s213_s15 = scalar_lea.vmem [#allocation2], %s1282_s9  ;;  %p1746_p10 = pnand %p1390_p8, %p1723_p6 }
  0x15   : > { %s220_s16 = sshll.u32 %s213_s15, 4  ;;  %s210_s18 = scalar_lea.sflag [#allocation3], %s209_s8  ;;  %s221_s16 = int_to_ptr.vmem [resolvable:$true] %s220_s16 }
  0x16   : > { %p1544_p11 = pneg %p1746_p10  ;;  %s1555_s26 = scalar_lea.vmem %s221_s16, 1024 }
  0x17   : > { %p1556_p12 = scmp.ne.s32.totalorder %s221_s16, %s1555_s26  ;;  %s1638_s29 = smov [#allocation2]  }
  0x18   : > { %s219_s14 = scalar_lea.hbm %s2344_s0, %s1316_s10  ;;  %s1560_s7 = sshll.u32 %s1638_s29, 4  ;;  %s1561_s7 = int_to_ptr.vmem [resolvable:$false] %s1560_s7 }
  0x19   : > { %p1558_p13 = pnand %p1556_p12, %p1544_p11  ;;  %s1562_s10 = scalar_lea.vmem %s1561_s7, 2048 }
  0x1a   : > { %p1563_p1 = scmp.lt.s32.totalorder %s221_s16, %s1561_s7  ;;  %p1564_p2 = scmp.lt.s32.totalorder %s1562_s10, %s1555_s26 }
  0x1b   : > { %p1559_p0 = pneg %p1558_p13 }
  0x1c   : > { %p1565_p3 = por %p1564_p2, %p1563_p1 }
  0x1e   : > { %p1566_p4 = pnand %p1565_p3, %p1559_p0 }
  0x20   : > { %1569 = shalt.err (!%p1566_p4)
}
  0x21   : > { %s1639_s30 = smov 64   ;;  %s1640_s8 = smov 4  }
  0x22   : > { %1389 = dma.hbm_to_vmem [thread:$0]  (!%p1746_p10), %s219_s14, 1024, %s221_s16, %s210_s18, %s1639_s30, %s1639_s30, %s1640_s8  }
  0x23   : > { %p1285_p5 = scmp.ge.s32.totalorder %s1636_s25, 1  ;;  %p259_p6 = scmp.lt.s32.totalorder %s1636_s25, 5 }
  0x25   : > { %p260_p8 = pnand %p1285_p5, %p259_p6 }
  0x26   : > { %s265_s9 = sand.u32 (!%p260_p8), 1, %s1612_s19  }
  0x27   : > { %263 = sbr.rel (%p260_p8) target bundleno = 791 (0x317), region = 36  ;;  %s1286_s12 = sshll.u32 (!%p260_p8), %s265_s9, 6 }
  0x28   : > { %s266_s13 = scalar_lea.sflag (!%p260_p8), [#allocation3], %s265_s9  ;;  %s1757_s15 = scalar_lea.vmem (!%p260_p8), [#allocation2], %s1286_s12 }
  0x2c   : > { %1603 = dma.done.wait (%p1729_p7), %s266_s13, 1024  }
  0x2d   : > { %1605 = vsyncadd (%p1729_p7), %s266_s13, 4294966272  ;;  %s1287_s14 = sshll.u32 %s1620_s21, 4  ;;  %p323_p9 = scmp.lt.s32.totalorder %s1624_s22, 1 }
  0x2e   : > { %p325_p10 = scmp.lt.s32.totalorder %s1287_s14, 31  ;;  %p339_p11 = scmp.lt.s32.totalorder %s1620_s21, 1 }
  0x2f   : > { %s2377_s22 = smov (!%p323_p9, %s1624_s22), 1  ;;  %p1297_p7 = scmp.ne.s32.totalorder %s1620_s21, 0 }
  0x30   : > { %s2379_s14 = smov (!%p325_p10, %s1287_s14), 31  ;;  %s1288_s16 = sshll.u32 %s2377_s22, 5 }
  0x31   : > { %s1317_s17 = sshll.u32 %s2377_s22, 7  ;;  %s328_s18 = sadd.s32 %s1288_s16, %s2379_s14 }
  0x32   : > { %s1770_s7 = scalar_lea.vmem %s2334_s2, %s1317_s17  ;;  %s1289_s6 = sshll.u32 %s328_s18, 2 }
  0x33   : > { %s1292_s10 = sshll.u32 %s2377_s22, 1  ;;  %s1775_s9 = scalar_lea.vmem %s2333_s1, %s1289_s6 }
  0x34   : > { %s1780_s0 = scalar_lea.vmem %s2336_s4, %s1317_s17  ;;  %s1786_s16 = scalar_lea.vmem %s2337_s5, %s1317_s17 }
  0x35   : > { %s340_s28 = scalar_select %p339_p11, %s1620_s21, 1 }
  0x36   : > { %358 = sbr.rel (%p1297_p7) target bundleno = 76 (0x4c), region = 44 }
  0x37   : > { %s1788_s26 = sadd.s32 %s1292_s10, %s340_s28 }
  0x38   : > { %s343_s29 = scalar_lea.vmem %s2335_s3, %s1788_s26 }
  0x3b   : > { %vm359_vm0 = vcmask 7168   ;;  %v1641_v0 = vmov -1e+09   ;;  %v1642_v1 = vmov 0.0  }
  0x3c   : > { %360 = vst.msk [vmem:[%s1780_s0] sm:$0xff] %vm359_vm0, %v1641_v0  ;;  %361 = vst.msk [vmem:[%s1780_s0 + $0x8] sm:$0xff] %vm359_vm0, %v1641_v0 }
  0x3d   : > { %362 = vst.msk [vmem:[%s1780_s0 + $0x10] sm:$0xff] %vm359_vm0, %v1641_v0  ;;  %363 = vst.msk [vmem:[%s1780_s0 + $0x18] sm:$0xff] %vm359_vm0, %v1641_v0 }
  0x3e   : > { %364 = vst.msk [vmem:[%s1780_s0 + $0x20] sm:$0xff] %vm359_vm0, %v1641_v0  ;;  %365 = vst.msk [vmem:[%s1780_s0 + $0x28] sm:$0xff] %vm359_vm0, %v1641_v0 }
  0x3f   : > { %366 = vst.msk [vmem:[%s1780_s0 + $0x30] sm:$0xff] %vm359_vm0, %v1641_v0  ;;  %367 = vst.msk [vmem:[%s1780_s0 + $0x38] sm:$0xff] %vm359_vm0, %v1641_v0 }
  0x40   : > { %368 = vst.msk [vmem:[%s1780_s0 + $0x40] sm:$0xff] %vm359_vm0, %v1641_v0  ;;  %369 = vst.msk [vmem:[%s1780_s0 + $0x48] sm:$0xff] %vm359_vm0, %v1641_v0 }
  0x41   : > { %370 = vst.msk [vmem:[%s1780_s0 + $0x50] sm:$0xff] %vm359_vm0, %v1641_v0  ;;  %371 = vst.msk [vmem:[%s1780_s0 + $0x58] sm:$0xff] %vm359_vm0, %v1641_v0 }
  0x42   : > { %372 = vst.msk [vmem:[%s1780_s0 + $0x60] sm:$0xff] %vm359_vm0, %v1641_v0  ;;  %373 = vst.msk [vmem:[%s1780_s0 + $0x68] sm:$0xff] %vm359_vm0, %v1641_v0 }
  0x43   : > { %374 = vst.msk [vmem:[%s1780_s0 + $0x70] sm:$0xff] %vm359_vm0, %v1641_v0  ;;  %375 = vst.msk [vmem:[%s1780_s0 + $0x78] sm:$0xff] %vm359_vm0, %v1641_v0 }
  0x44   : > { %376 = vst.msk [vmem:[%s1786_s16] sm:$0xff] %vm359_vm0, %v1642_v1  ;;  %377 = vst.msk [vmem:[%s1786_s16 + $0x8] sm:$0xff] %vm359_vm0, %v1642_v1 }
  0x45   : > { %378 = vst.msk [vmem:[%s1786_s16 + $0x10] sm:$0xff] %vm359_vm0, %v1642_v1  ;;  %379 = vst.msk [vmem:[%s1786_s16 + $0x18] sm:$0xff] %vm359_vm0, %v1642_v1 }
  0x46   : > { %380 = vst.msk [vmem:[%s1786_s16 + $0x20] sm:$0xff] %vm359_vm0, %v1642_v1  ;;  %381 = vst.msk [vmem:[%s1786_s16 + $0x28] sm:$0xff] %vm359_vm0, %v1642_v1 }
  0x47   : > { %382 = vst.msk [vmem:[%s1786_s16 + $0x30] sm:$0xff] %vm359_vm0, %v1642_v1  ;;  %383 = vst.msk [vmem:[%s1786_s16 + $0x38] sm:$0xff] %vm359_vm0, %v1642_v1 }
  0x48   : > { %384 = vst.msk [vmem:[%s1786_s16 + $0x40] sm:$0xff] %vm359_vm0, %v1642_v1  ;;  %385 = vst.msk [vmem:[%s1786_s16 + $0x48] sm:$0xff] %vm359_vm0, %v1642_v1 }
  0x49   : > { %386 = vst.msk [vmem:[%s1786_s16 + $0x50] sm:$0xff] %vm359_vm0, %v1642_v1  ;;  %387 = vst.msk [vmem:[%s1786_s16 + $0x58] sm:$0xff] %vm359_vm0, %v1642_v1 }
  0x4a   : > { %388 = vst.msk [vmem:[%s1786_s16 + $0x60] sm:$0xff] %vm359_vm0, %v1642_v1  ;;  %389 = vst.msk [vmem:[%s1786_s16 + $0x68] sm:$0xff] %vm359_vm0, %v1642_v1 }
  0x4b   : > { %390 = vst.msk [vmem:[%s1786_s16 + $0x70] sm:$0xff] %vm359_vm0, %v1642_v1  ;;  %391 = vst.msk [vmem:[%s1786_s16 + $0x78] sm:$0xff] %vm359_vm0, %v1642_v1 }
  0x4c PF: > { %v1462_v2 = vld [vmem:[%s1775_s9 + $0x38] sm:$0xff]   ;;  %v1463_v3 = vld [vmem:[%s1775_s9 + $0x30] sm:$0xff]   ;;  %v1643_v4 = vmov 0   ;;  %v1464_v5 = vld [vmem:[%s1775_s9 + $0x28] sm:$0xff]   ;;  %v732_v55 = vlaneseq }
  0x4d   : > { %1460 = vset.pattern.permute.xlu0 %v1643_v4  ;;  %1461 = vset.pattern.permute.xlu1 %v1643_v4  ;;  %v1470_v6 = vld [vmem:[%s1757_s15] sm:$0xff]   ;;  %v619_v10 = vld [vmem:[%s1770_s7 + $0x10] sm:$0xff]  ;;  %v618_v11 = vld [vmem:[%s1770_s7 + $0x8] sm:$0xff] }
  0x4e   : > { %1336 = vmatprep.subr.bf16.mxu0 %v1462_v2  ;;  %1368 = vmatprep.subr.bf16.mxu1 %v1462_v2  ;;  %v1471_v7 = vld [vmem:[%s1757_s15 + $0x20] sm:$0xff]   ;;  %vm635_vm2 = vcmp.gt.f32.partialorder %v619_v10, 0.5  ;;  %v620_v12 = vld [vmem:[%s1770_s7 + $0x18] sm:$0xff]  ;;  %vm634_vm3 = vcmp.gt.f32.partialorder %v618_v11, 0.5  ;;  %v622_v16 = vld [vmem:[%s1770_s7 + $0x28] sm:$0xff]  ;;  %v733_v59 = vshrl.u32 %v732_v55, 7 }
  0x4f   : > { %1337 = vmatpush3.bf16.xpose.msra.mxu0 %v1462_v2  ;;  %1376 = vmatpush3.bf16.xpose.msra.mxu1 %v1462_v2  ;;  %v1465_v8 = vld [vmem:[%s1775_s9 + $0x20] sm:$0xff]   ;;  %v653_v14 = vsel %vm635_vm2, 1, %v1643_v4  ;;  %vm636_vm4 = vcmp.gt.f32.partialorder %v620_v12, 0.5  ;;  %v652_v17 = vsel %vm634_vm3, 1, %v1643_v4  ;;  %vm638_vm6 = vcmp.gt.f32.partialorder %v622_v16, 0.5  ;;  %v1466_v19 = vld [vmem:[%s1775_s9 + $0x18] sm:$0xff]  }
  0x50   : > { %1338 = vmatprep.subr.bf16.mxu0 %v1463_v3  ;;  %1369 = vmatprep.subr.bf16.mxu1 %v1463_v3  ;;  %v617_v9 = vld [vmem:[%s1770_s7] sm:$0xff]  ;;  %v654_v18 = vsel %vm636_vm4, 1, %v1643_v4  ;;  %v623_v20 = vld [vmem:[%s1770_s7 + $0x30] sm:$0xff]  ;;  %v624_v21 = vld [vmem:[%s1770_s7 + $0x38] sm:$0xff]  ;;  %v656_v23 = vsel %vm638_vm6, 1, %v1643_v4  ;;  %v734_v61 = vsub.s32 0, %v733_v59 }
  0x51   : > { %1352 = vmatprep.mubr.bf16.mxu0 %v1470_v6  ;;  %1360 = vmatprep.mubr.bf16.mxu1 %v1471_v7  ;;  %vm633_vm1 = vcmp.gt.f32.partialorder %v617_v9, 0.5  ;;  %v621_v15 = vld [vmem:[%s1770_s7 + $0x20] sm:$0xff]  ;;  %vm639_vm7 = vcmp.gt.f32.partialorder %v623_v20, 0.5  ;;  %vm640_vm8 = vcmp.gt.f32.partialorder %v624_v21, 0.5  ;;  %v626_v25 = vld [vmem:[%s1770_s7 + $0x48] sm:$0xff]  ;;  %v1467_v28 = vld [vmem:[%s1775_s9 + $0x10] sm:$0xff]  }
  0x52   : > { %v651_v13 = vsel %vm633_vm1, 1, %v1643_v4  ;;  %674 = vperm.xlu1 %1461, %v653_v14   ;;  %vm637_vm5 = vcmp.gt.f32.partialorder %v621_v15, 0.5  ;;  %v625_v24 = vld [vmem:[%s1770_s7 + $0x40] sm:$0xff]  ;;  %v657_v26 = vsel %vm639_vm7, 1, %v1643_v4  ;;  %v658_v27 = vsel %vm640_vm8, 1, %v1643_v4  ;;  %v627_v29 = vld [vmem:[%s1770_s7 + $0x50] sm:$0xff] }
  0x53   : > { %668 = vperm.xlu0 %1460, %v651_v13   ;;  %v655_v22 = vsel %vm637_vm5, 1, %v1643_v4  ;;  %vm641_vm9 = vcmp.gt.f32.partialorder %v625_v24, 0.5  ;;  %vm642_vm10 = vcmp.gt.f32.partialorder %v626_v25, 0.5  ;;  %v628_v30 = vld [vmem:[%s1770_s7 + $0x58] sm:$0xff]  ;;  %vm643_vm11 = vcmp.gt.f32.partialorder %v627_v29, 0.5  ;;  %v629_v33 = vld [vmem:[%s1770_s7 + $0x60] sm:$0xff] }
  0x54   : > { %v659_v31 = vsel %vm641_vm9, 1, %v1643_v4  ;;  %v660_v32 = vsel %vm642_vm10, 1, %v1643_v4  ;;  %vm644_vm12 = vcmp.gt.f32.partialorder %v628_v30, 0.5  ;;  %v630_v34 = vld [vmem:[%s1770_s7 + $0x68] sm:$0xff]  ;;  %v661_v35 = vsel %vm643_vm11, 1, %v1643_v4  ;;  %v631_v38 = vld [vmem:[%s1770_s7 + $0x70] sm:$0xff] }
  0x55   : > { %v662_v36 = vsel %vm644_vm12, 1, %v1643_v4  ;;  %vm645_vm13 = vcmp.gt.f32.partialorder %v629_v33, 0.5  ;;  %vm646_vm14 = vcmp.gt.f32.partialorder %v630_v34, 0.5  ;;  %v1468_v37 = vld [vmem:[%s1775_s9 + $0x8] sm:$0xff]   ;;  %v632_v39 = vld [vmem:[%s1770_s7 + $0x78] sm:$0xff]  ;;  %vm647_vm15 = vcmp.gt.f32.partialorder %v631_v38, 0.5 }
  0x56   : > { %677 = vperm.xlu1 %1461, %v654_v18   ;;  %v663_v40 = vsel %vm645_vm13, 1, %v1643_v4  ;;  %v664_v41 = vsel %vm646_vm14, 1, %v1643_v4  ;;  %vm648_vm0 = vcmp.gt.f32.partialorder %v632_v39, 0.5  ;;  %v665_v42 = vsel %vm647_vm15, 1, %v1643_v4  ;;  %v1469_v44 = vld [vmem:[%s1775_s9] sm:$0xff]   ;;  %v1472_v45 = vld [vmem:[%s1757_s15 + $0x8] sm:$0xff]  }
  0x57   : > { %1339 = vmatpush3.bf16.xpose.msra.mxu0 %v1463_v3  ;;  %1377 = vmatpush3.bf16.xpose.msra.mxu1 %v1463_v3  ;;  %v666_v43 = vsel %vm648_vm0, 1, %v1643_v4  ;;  %v1473_v46 = vld [vmem:[%s1757_s15 + $0x28] sm:$0xff]   ;;  %v1474_v47 = vld [vmem:[%s1757_s15 + $0x10] sm:$0xff]   ;;  %v1476_v49 = vld [vmem:[%s1757_s15 + $0x18] sm:$0xff]  }
  0x58   : > { %1340 = vmatprep.subr.bf16.mxu0 %v1464_v5  ;;  %1370 = vmatprep.subr.bf16.mxu1 %v1464_v5  ;;  %v1475_v48 = vld [vmem:[%s1757_s15 + $0x30] sm:$0xff]   ;;  %v1477_v50 = vld [vmem:[%s1757_s15 + $0x38] sm:$0xff]   ;;  %v649_v58 = vld [vmem:[%s343_s29] sm:$0x1] }
  0x59   : > { %671 = vperm.xlu0 %1460, %v652_v17   ;;  %vm650_vm1 = vcmp.gt.f32.partialorder %v649_v58, 0.5  ;;  %v2041_v55 = vld [vmem:[%s1780_s0 + $0x18] sm:$0xff] }
  0x5a   : > { %683 = vperm.xlu1 %1461, %v656_v23   ;;  %v731_v63 = vsel %vm650_vm1, 1, %v1643_v4 }
  0x5b   : > { %v1919_v0 = vrot.slane %v731_v63, %v734_v61  ;;  %v2065_v63 = vld [vmem:[%s1780_s0 + $0x58] sm:$0xff] }
  0x5d   : > { %680 = vperm.xlu0 %1460, %v655_v22   ;;  %vm736_vm4 = vcmp.eq.s32.totalorder %v1919_v0, 1  ;;  %v2068_v0 = vld [vmem:[%s1780_s0 + $0x30] sm:$0xff] }
  0x5e   : > { %689 = vperm.xlu1 %1461, %v658_v27  }
  0x5f   : > { %1341 = vmatpush3.bf16.xpose.msra.mxu0 %v1464_v5  ;;  %1378 = vmatpush3.bf16.xpose.msra.mxu1 %v1464_v5 }
  0x60   : > { %1342 = vmatprep.subr.bf16.mxu0 %v1465_v8  ;;  %1371 = vmatprep.subr.bf16.mxu1 %v1465_v8 }
  0x61   : > { %686 = vperm.xlu0 %1460, %v657_v26  }
  0x62   : > { %695 = vperm.xlu1 %1461, %v660_v32  }
  0x65   : > { %692 = vperm.xlu0 %1460, %v659_v31  }
  0x66   : > { %701 = vperm.xlu1 %1461, %v662_v36  }
  0x67   : > { %1343 = vmatpush3.bf16.xpose.msra.mxu0 %v1465_v8  ;;  %1379 = vmatpush3.bf16.xpose.msra.mxu1 %v1465_v8 }
  0x68   : > { %1344 = vmatprep.subr.bf16.mxu0 %v1466_v19  ;;  %1372 = vmatprep.subr.bf16.mxu1 %v1466_v19 }
  0x69   : > { %698 = vperm.xlu0 %1460, %v661_v35  }
  0x6a   : > { %707 = vperm.xlu1 %1461, %v664_v41   ;;  %v2005_v41 = vld [vmem:[%s1780_s0 + $0x50] sm:$0xff] }
  0x6d   : > { %704 = vperm.xlu0 %1460, %v663_v40  }
  0x6e   : > { %713 = vperm.xlu1 %1461, %v666_v43  }
  0x6f   : > { %1345 = vmatpush3.bf16.xpose.msra.mxu0 %v1466_v19  ;;  %1380 = vmatpush3.bf16.xpose.msra.mxu1 %v1466_v19 }
  0x70   : > { %1346 = vmatprep.subr.bf16.mxu0 %v1467_v28  ;;  %1373 = vmatprep.subr.bf16.mxu1 %v1467_v28 }
  0x71   : > { %710 = vperm.xlu0 %1460, %v665_v42   ;;  %v2008_v42 = vld [vmem:[%s1780_s0 + $0x10] sm:$0xff] }
  0x77   : > { %1347 = vmatpush3.bf16.xpose.msra.mxu0 %v1467_v28  ;;  %1381 = vmatpush3.bf16.xpose.msra.mxu1 %v1467_v28 }
  0x78   : > { %1348 = vmatprep.subr.bf16.mxu0 %v1468_v37  ;;  %1374 = vmatprep.subr.bf16.mxu1 %v1468_v37 }
  0x7f   : > { %1349 = vmatpush3.bf16.xpose.msra.mxu0 %v1468_v37  ;;  %1382 = vmatpush3.bf16.xpose.msra.mxu1 %v1468_v37 }
  0x80   : > { %1350 = vmatprep.subr.bf16.mxu0 %v1469_v44  ;;  %1375 = vmatprep.subr.bf16.mxu1 %v1469_v44 }
  0x87   : > { %1351 = vmatpush3.bf16.xpose.msra.mxu0 %v1469_v44  ;;  %1383 = vmatpush3.bf16.xpose.msra.mxu1 %v1469_v44 }
  0x8e   : > { %1353 = vmatmul.mubr.bf16.vlgmr.msra.gmra.mxu0 %v1472_v45  ;;  %1361 = vmatmul.mubr.bf16.vlgmr.msra.gmra.mxu1 %v1473_v46 }
  0x8f   : > { %1356 = vmatprep.mubr.bf16.mxu0 %v1474_v47  ;;  %1364 = vmatprep.mubr.bf16.mxu1 %v1475_v48  ;;  %v2017_v47 = vld [vmem:[%s1780_s0 + $0x40] sm:$0xff] }
  0x90   : > { %v2020_v48 = vld [vmem:[%s1780_s0] sm:$0xff] }
  0x96   : > { %1357 = vmatmul.mubr.bf16.gmra.mxu0 %v1476_v49  ;;  %1365 = vmatmul.mubr.bf16.gmra.mxu1 %v1477_v50 }
  0xcd   : > { %v675_v53 = vpop.permute.xlu1 %674 }
  0xce   : > { %v669_v51 = vpop.permute.xlu0 %668  ;;  %vm717_vm2 = vcmp.eq.s32.totalorder %v675_v53, 1 }
  0xcf   : > { %vm739_vm5 = vmand %vm717_vm2, %vm736_vm4  ;;  %vm715_vm6 = vcmp.eq.s32.totalorder %v669_v51, 1 }
  0xd0   : > { %vm737_vm9 = vmand %vm715_vm6, %vm736_vm4 }
  0xd1   : > { %v678_v56 = vpop.permute.xlu1 %677 }
  0xd2   : > { %vm718_vm10 = vcmp.eq.s32.totalorder %v678_v56, 1  ;;  %v2044_v56 = vld [vmem:[%s1780_s0 + $0x8] sm:$0xff] }
  0xd3   : > { %vm740_vm13 = vmand %vm718_vm10, %vm736_vm4 }
  0xd4   : > { %v672_v52 = vpop.permute.xlu0 %671 }
  0xd5   : > { %v1916_v60 = vpop.permute.xlu1 %683  ;;  %vm716_vm12 = vcmp.eq.s32.totalorder %v672_v52, 1 }
  0xd6   : > { %vm738_vm15 = vmand %vm716_vm12, %vm736_vm4 }
  0xd8   : > { %v1909_v54 = vpop.permute.xlu0 %680 }
  0xd9   : > { %v690_v1 = vpop.permute.xlu1 %689  ;;  %vm719_vm2 = vcmp.eq.s32.totalorder %v1909_v54, 1 }
  0xda   : > { %vm741_vm6 = vmand %vm719_vm2, %vm736_vm4 }
  0xdc   : > { %v687_v57 = vpop.permute.xlu0 %686 }
  0xdd   : > { %v696_v6 = vpop.permute.xlu1 %695  ;;  %vm721_vm14 = vcmp.eq.s32.totalorder %v687_v57, 1 }
  0xde   : > { %vm743_vm1 = vmand %vm721_vm14, %vm736_vm4 }
  0xe0   : > { %v693_v62 = vpop.permute.xlu0 %692 }
  0xe1   : > { %vm723_vm8 = vcmp.eq.s32.totalorder %v693_v62, 1  ;;  %v702_v15 = vpop.permute.xlu1 %701 }
  0xe2   : > { %vm745_vm11 = vmand %vm723_vm8, %vm736_vm4  ;;  %vm726_vm0 = vcmp.eq.s32.totalorder %v702_v15, 1 }
  0xe4   : > { %v699_v2 = vpop.permute.xlu0 %698 }
  0xe5   : > { %vm725_vm3 = vcmp.eq.s32.totalorder %v699_v2, 1  ;;  %v708_v30 = vpop.permute.xlu1 %707 }
  0xe6   : > { %vm747_vm7 = vmand %vm725_vm3, %vm736_vm4 }
  0xe7   : > { %vm748_vm3 = vmand %vm726_vm0, %vm736_vm4  ;;  %vm728_vm0 = vcmp.eq.s32.totalorder %v708_v30, 1 }
  0xe8   : > { %v705_v20 = vpop.permute.xlu0 %704 }
  0xe9   : > { %v714_v37 = vpop.permute.xlu1 %713 }
  0xea   : > { %vm730_vm2 = vcmp.eq.s32.totalorder %v714_v37, 1  ;;  %v2137_v37 = vld [vmem:[%s1780_s0 + $0x70] sm:$0xff] }
  0xec   : > { %v711_v25 = vpop.permute.xlu0 %710 }
 0x14e   : > { %v1354_v3 = vpop.f32.mrf.mxu0  ;;  %v1362_v5 = vpop.f32.mrf.mxu1 }
 0x14f   : > { %v1926_v4 = vsel %vm747_vm7, %v1362_v5, -1e+09  ;;  %v1928_v7 = vsel %vm739_vm5, %v1354_v3, -1e+09  ;;  %vm724_vm5 = vcmp.eq.s32.totalorder %v696_v6, 1  ;;  %vm722_vm7 = vcmp.eq.s32.totalorder %v690_v1, 1 }
 0x150   : > { %805 = vmax.xlane.f32.xlu1 %v1926_v4  ;;  %v586_v8 = vpop.f32.mrf.mxu1  ;;  %789 = vmax.xlane.f32.xlu0 %v1928_v7  ;;  %v554_v9 = vpop.f32.mrf.mxu0  ;;  %vm746_vm8 = vmand %vm724_vm5, %vm736_vm4  ;;  %vm1089_vm5 = vcmask 7168  }
 0x151   : > { %v1936_v11 = vsel %vm745_vm11, %v586_v8, -1e+09  ;;  %v1938_v12 = vsel %vm737_vm9, %v554_v9, -1e+09  ;;  %vm727_vm9 = vcmp.eq.s32.totalorder %v705_v20, 1  ;;  %vm744_vm10 = vmand %vm722_vm7, %vm736_vm4  ;;  %vm720_vm11 = vcmp.eq.s32.totalorder %v1916_v60, 1 }
 0x152   : > { %v1355_v10 = vpop.f32.mrf.mxu0  ;;  %v1363_v13 = vpop.f32.mrf.mxu1  ;;  %vm749_vm12 = vmand %vm727_vm9, %vm736_vm4  ;;  %v2089_v9 = vld [vmem:[%s1780_s0 + $0x48] sm:$0xff] }
 0x153   : > { %v1946_v16 = vsel %vm740_vm13, %v1355_v10, -1e+09  ;;  %v1957_v21 = vsel %vm748_vm3, %v1363_v13, -1e+09  ;;  %vm729_vm13 = vcmp.eq.s32.totalorder %v711_v25, 1  ;;  %vm742_vm14 = vmand %vm720_vm11, %vm736_vm4  ;;  %v2092_v10 = vld [vmem:[%s1780_s0 + $0x20] sm:$0xff] }
 0x154   : > { %801 = vmax.xlane.f32.xlu1 %v1936_v11  ;;  %785 = vmax.xlane.f32.xlu0 %v1938_v12  ;;  %v557_v14 = vpop.f32.mrf.mxu0  ;;  %v589_v18 = vpop.f32.mrf.mxu1  ;;  %vm752_vm3 = vmand %vm730_vm2, %vm736_vm4 }
 0x155   : > { %v1948_v17 = vsel %vm738_vm15, %v557_v14, -1e+09  ;;  %v1967_v26 = vsel %vm746_vm8, %v589_v18, -1e+09  ;;  %vm751_vm15 = vmand %vm729_vm13, %vm736_vm4 }
 0x156   : > { %v1358_v19 = vpop.f32.mrf.mxu0  ;;  %v1366_v23 = vpop.f32.mrf.mxu1 }
 0x157   : > { %v1959_v22 = vsel %vm743_vm1, %v1358_v19, -1e+09  ;;  %v1988_v35 = vsel %vm751_vm15, %v1366_v23, -1e+09  ;;  %vm750_vm1 = vmand %vm728_vm0, %vm736_vm4  ;;  %v2113_v23 = vld [vmem:[%s1780_s0 + $0x60] sm:$0xff] }
 0x158   : > { %791 = vmax.xlane.f32.xlu0 %v1946_v16  ;;  %787 = vmax.xlane.f32.xlu1 %v1948_v17  ;;  %v570_v24 = vpop.f32.mrf.mxu0  ;;  %v602_v28 = vpop.f32.mrf.mxu1 }
 0x159   : > { %v1969_v27 = vsel %vm741_vm6, %v570_v24, -1e+09  ;;  %v1978_v31 = vsel %vm749_vm12, %v602_v28, -1e+09  ;;  %v2116_v24 = vld [vmem:[%s1780_s0 + $0x38] sm:$0xff] }
 0x15a   : > { %v1359_v29 = vpop.f32.mrf.mxu0  ;;  %v1367_v33 = vpop.f32.mrf.mxu1 }
 0x15b   : > { %v1980_v32 = vsel %vm744_vm10, %v1359_v29, -1e+09  ;;  %v2001_v40 = vsel %vm752_vm3, %v1367_v33, -1e+09 }
 0x15c   : > { %807 = vmax.xlane.f32.xlu0 %v1957_v21  ;;  %797 = vmax.xlane.f32.xlu1 %v1959_v22  ;;  %v573_v34 = vpop.f32.mrf.mxu0  ;;  %v605_v38 = vpop.f32.mrf.mxu1 }
 0x15d   : > { %v1990_v36 = vsel %vm742_vm14, %v573_v34, -1e+09  ;;  %v1996_v39 = vsel %vm750_vm1, %v605_v38, -1e+09  ;;  %v2140_v38 = vld [vmem:[%s1780_s0 + $0x28] sm:$0xff] }
 0x160   : > { %803 = vmax.xlane.f32.xlu0 %v1967_v26  ;;  %793 = vmax.xlane.f32.xlu1 %v1969_v27 }
 0x164   : > { %809 = vmax.xlane.f32.xlu1 %v1978_v31  ;;  %799 = vmax.xlane.f32.xlu0 %v1980_v32 }
 0x168   : > { %813 = vmax.xlane.f32.xlu1 %v1988_v35  ;;  %795 = vmax.xlane.f32.xlu0 %v1990_v36 }
 0x16c   : > { %811 = vmax.xlane.f32.xlu0 %v1996_v39 }
 0x170   : > { %815 = vmax.xlane.f32.xlu0 %v2001_v40 }
 0x1d9   : > { %v806_v43 = vpop.xlane.xlu1 %805  ;;  %v790_v44 = vpop.xlane.xlu0 %789 }
 0x1da   : > { %v2011_v45 = vmax.f32 %v2005_v41, %v806_v43  ;;  %v2014_v46 = vmax.f32 %v2008_v42, %v790_v44 }
 0x1dc   : > { %1116 = vst.msk [vmem:[%s1780_s0 + $0x50] sm:$0xff] %vm1089_vm5, %v2011_v45  ;;  %v835_v50 = vsub.f32 %v2008_v42, %v2014_v46  ;;  %1108 = vst.msk [vmem:[%s1780_s0 + $0x10] sm:$0xff] %vm1089_vm5, %v2014_v46  ;;  %925 = vperm.xlu1 %1461, %v2014_v46   ;;  %965 = vperm.xlu0 %1460, %v2011_v45  }
 0x1dd   : > { %v802_v51 = vpop.xlane.xlu1 %801  ;;  %v786_v52 = vpop.xlane.xlu0 %785 }
 0x1de   : > { %v2035_v53 = vmax.f32 %v2017_v47, %v802_v51  ;;  %v2038_v54 = vmax.f32 %v2020_v48, %v786_v52 }
 0x1e0   : > { %1114 = vst.msk [vmem:[%s1780_s0 + $0x40] sm:$0xff] %vm1089_vm5, %v2035_v53  ;;  %1106 = vst.msk [vmem:[%s1780_s0] sm:$0xff] %vm1089_vm5, %v2038_v54  ;;  %915 = vperm.xlu1 %1461, %v2038_v54   ;;  %955 = vperm.xlu0 %1460, %v2035_v53  }
 0x1e1   : > { %v792_v59 = vpop.xlane.xlu0 %791  ;;  %v788_v60 = vpop.xlane.xlu1 %787 }
 0x1e2   : > { %v2059_v61 = vmax.f32 %v2041_v55, %v792_v59  ;;  %v2062_v62 = vmax.f32 %v2044_v56, %v788_v60 }
 0x1e4   : > { %1109 = vst.msk [vmem:[%s1780_s0 + $0x18] sm:$0xff] %vm1089_vm5, %v2059_v61  ;;  %1107 = vst.msk [vmem:[%s1780_s0 + $0x8] sm:$0xff] %vm1089_vm5, %v2062_v62  ;;  %930 = vperm.xlu1 %1461, %v2059_v61   ;;  %920 = vperm.xlu0 %1460, %v2062_v62   ;;  %v2349_v42 = vsub.f32 %v2041_v55, %v2059_v61 }
 0x1e5   : > { %v808_v3 = vpop.xlane.xlu0 %807  ;;  %v798_v5 = vpop.xlane.xlu1 %797 }
 0x1e6   : > { %v2083_v6 = vmax.f32 %v2065_v63, %v808_v3  ;;  %v2086_v8 = vmax.f32 %v2068_v0, %v798_v5  ;;  %v2161_v3 = vld [vmem:[%s1780_s0 + $0x68] sm:$0xff]  ;;  %v855_v46 = vmul.f32 1.442695, %v2349_v42 }
 0x1e7   : > { %v890_v42 = vld [vmem:[%s1786_s16 + $0x48] sm:$0xff] }
 0x1e8   : > { %1117 = vst.msk [vmem:[%s1780_s0 + $0x58] sm:$0xff] %vm1089_vm5, %v2083_v6  ;;  %1112 = vst.msk [vmem:[%s1780_s0 + $0x30] sm:$0xff] %vm1089_vm5, %v2086_v8  ;;  %970 = vperm.xlu1 %1461, %v2083_v6   ;;  %945 = vperm.xlu0 %1460, %v2086_v8  }
 0x1e9   : > { %v804_v15 = vpop.xlane.xlu0 %803  ;;  %v794_v18 = vpop.xlane.xlu1 %793 }
 0x1ea   : > { %v2107_v19 = vmax.f32 %v2089_v9, %v804_v15  ;;  %v2110_v20 = vmax.f32 %v2092_v10, %v794_v18 }
 0x1ec   : > { %1115 = vst.msk [vmem:[%s1780_s0 + $0x48] sm:$0xff] %vm1089_vm5, %v2107_v19  ;;  %1110 = vst.msk [vmem:[%s1780_s0 + $0x20] sm:$0xff] %vm1089_vm5, %v2110_v20  ;;  %960 = vperm.xlu1 %1461, %v2107_v19   ;;  %935 = vperm.xlu0 %1460, %v2110_v20  }
 0x1ed   : > { %v810_v29 = vpop.xlane.xlu1 %809  ;;  %v800_v30 = vpop.xlane.xlu0 %799 }
 0x1ee   : > { %v2131_v33 = vmax.f32 %v2113_v23, %v810_v29  ;;  %v2134_v34 = vmax.f32 %v2116_v24, %v800_v30  ;;  %v2179_v30 = vld [vmem:[%s1780_s0 + $0x78] sm:$0xff] }
 0x1f0   : > { %1118 = vst.msk [vmem:[%s1780_s0 + $0x60] sm:$0xff] %vm1089_vm5, %v2131_v33  ;;  %1113 = vst.msk [vmem:[%s1780_s0 + $0x38] sm:$0xff] %vm1089_vm5, %v2134_v34  ;;  %950 = vperm.xlu1 %1461, %v2134_v34   ;;  %975 = vperm.xlu0 %1460, %v2131_v33  }
 0x1f1   : > { %v814_v51 = vpop.xlane.xlu1 %813  ;;  %v796_v52 = vpop.xlane.xlu0 %795 }
 0x1f2   : > { %v2155_v59 = vmax.f32 %v2137_v37, %v814_v51  ;;  %v2158_v60 = vmax.f32 %v2140_v38, %v796_v52 }
 0x1f4   : > { %1120 = vst.msk [vmem:[%s1780_s0 + $0x70] sm:$0xff] %vm1089_vm5, %v2155_v59  ;;  %1111 = vst.msk [vmem:[%s1780_s0 + $0x28] sm:$0xff] %vm1089_vm5, %v2158_v60  ;;  %985 = vperm.xlu0 %1460, %v2155_v59   ;;  %940 = vperm.xlu1 %1461, %v2158_v60  }
 0x1f5   : > { %v812_v18 = vpop.xlane.xlu0 %811 }
 0x1f6   : > { %v2176_v29 = vmax.f32 %v2161_v3, %v812_v18 }
 0x1f8   : > { %1119 = vst.msk [vmem:[%s1780_s0 + $0x68] sm:$0xff] %vm1089_vm5, %v2176_v29  ;;  %980 = vperm.xlu1 %1461, %v2176_v29  }
 0x1f9   : > { %v816_v52 = vpop.xlane.xlu0 %815 }
 0x1fa   : > { %v2188_v5 = vmax.f32 %v2179_v30, %v816_v52 }
 0x1fc   : > { %1121 = vst.msk [vmem:[%s1780_s0 + $0x78] sm:$0xff] %vm1089_vm5, %v2188_v5  ;;  %990 = vperm.xlu1 %1461, %v2188_v5  }
 0x257   : > { %v926_v18 = vpop.permute.xlu1 %925  ;;  %v966_v43 = vpop.permute.xlu0 %965 }
 0x258   : > { %v995_v51 = vsub.f32 %v1928_v7, %v926_v18  ;;  %v1003_v44 = vsub.f32 %v1926_v4, %v966_v43 }
 0x25a   : > { %v1013_v28 = vmul.f32 1.442695, %v995_v51  ;;  %v1029_v25 = vmul.f32 1.442695, %v1003_v44 }
 0x25b   : > { %v916_v14 = vpop.permute.xlu1 %915  ;;  %v956_v13 = vpop.permute.xlu0 %955 }
 0x25c   : > { %1478 = vpow2.f32 %v1013_v28  ;;  %v993_v52 = vsub.f32 %v1938_v12, %v916_v14  ;;  %v1001_v15 = vsub.f32 %v1936_v11, %v956_v13 }
 0x25d   : > { %1480 = vpow2.f32 %v1029_v25 }
 0x25e   : > { %v1009_v2 = vmul.f32 1.442695, %v993_v52  ;;  %v1025_v1 = vmul.f32 1.442695, %v1001_v15 }
 0x25f   : > { %v931_v57 = vpop.permute.xlu1 %930  ;;  %v921_v58 = vpop.permute.xlu0 %920 }
 0x260   : > { %1482 = vpow2.f32 %v1009_v2  ;;  %v996_v49 = vsub.f32 %v1946_v16, %v931_v57  ;;  %v994_v7 = vsub.f32 %v1948_v17, %v921_v58 }
 0x261   : > { %1484 = vpow2.f32 %v1025_v1 }
 0x262   : > { %v1015_v4 = vmul.f32 1.442695, %v996_v49  ;;  %v1011_v43 = vmul.f32 1.442695, %v994_v7 }
 0x263   : > { %v971_v44 = vpop.permute.xlu1 %970  ;;  %v946_v51 = vpop.permute.xlu0 %945 }
 0x264   : > { %1486 = vpow2.f32 %v1015_v4  ;;  %v1004_v12 = vsub.f32 %v1957_v21, %v971_v44  ;;  %v999_v11 = vsub.f32 %v1959_v22, %v946_v51 }
 0x265   : > { %1488 = vpow2.f32 %v1011_v43 }
 0x266   : > { %v1031_v13 = vmul.f32 1.442695, %v1004_v12  ;;  %v1021_v14 = vmul.f32 1.442695, %v999_v11 }
 0x267   : > { %v961_v25 = vpop.permute.xlu1 %960  ;;  %v936_v28 = vpop.permute.xlu0 %935 }
 0x268   : > { %1490 = vpow2.f32 %v1031_v13  ;;  %v1002_v16 = vsub.f32 %v1967_v26, %v961_v25  ;;  %v997_v17 = vsub.f32 %v1969_v27, %v936_v28 }
 0x269   : > { %v1479_v57 = vpop.eup %1478  ;;  %1492 = vpow2.f32 %v1021_v14 }
 0x26a   : > { %v1481_v49 = vpop.eup %1480  ;;  %v1027_v58 = vmul.f32 1.442695, %v1002_v16  ;;  %v1017_v1 = vmul.f32 1.442695, %v997_v17  ;;  %1045 = vadd.xlane.f32.xlu0 %v1479_v57 }
 0x26b   : > { %1061 = vadd.xlane.f32.xlu1 %v1481_v49  ;;  %v951_v21 = vpop.permute.xlu1 %950  ;;  %v976_v2 = vpop.permute.xlu0 %975 }
 0x26c   : > { %1494 = vpow2.f32 %v1027_v58  ;;  %v1000_v22 = vsub.f32 %v1980_v32, %v951_v21  ;;  %v1005_v15 = vsub.f32 %v1978_v31, %v976_v2 }
 0x26d   : > { %v1483_v18 = vpop.eup %1482  ;;  %1496 = vpow2.f32 %v1017_v1 }
 0x26e   : > { %v1485_v52 = vpop.eup %1484  ;;  %v1023_v26 = vmul.f32 1.442695, %v1000_v22  ;;  %v1033_v7 = vmul.f32 1.442695, %v1005_v15  ;;  %1041 = vadd.xlane.f32.xlu0 %v1483_v18  ;;  %v2346_v22 = vsub.f32 %v2005_v41, %v2011_v45  ;;  %v2347_v18 = vsub.f32 %v2020_v48, %v2038_v54 }
 0x26f   : > { %1057 = vadd.xlane.f32.xlu1 %v1485_v52  ;;  %v941_v27 = vpop.permute.xlu1 %940  ;;  %v986_v4 = vpop.permute.xlu0 %985  ;;  %v2350_v41 = vsub.f32 %v2044_v56, %v2062_v62  ;;  %v2351_v48 = vsub.f32 %v2065_v63, %v2083_v6  ;;  %v2353_v54 = vsub.f32 %v2089_v9, %v2107_v19  ;;  %v2354_v56 = vsub.f32 %v2092_v10, %v2110_v20  ;;  %v883_v63 = vld [vmem:[%s1786_s16 + $0x10] sm:$0xff] }
 0x270   : > { %1498 = vpow2.f32 %v1023_v26  ;;  %v998_v43 = vsub.f32 %v1990_v36, %v941_v27  ;;  %v1007_v44 = vsub.f32 %v1988_v35, %v986_v4  ;;  %v869_v15 = vmul.f32 1.442695, %v2346_v22  ;;  %v891_v27 = vld [vmem:[%s1786_s16 + $0x50] sm:$0xff] }
 0x271   : > { %v1487_v51 = vpop.eup %1486  ;;  %1500 = vpow2.f32 %v1033_v7  ;;  %v849_v52 = vmul.f32 1.442695, %v2347_v18  ;;  %v2348_v26 = vsub.f32 %v2017_v47, %v2035_v53  ;;  %v851_v45 = vmul.f32 1.442695, %v2350_v41  ;;  %v887_v22 = vld [vmem:[%s1786_s16 + $0x30] sm:$0xff] }
 0x272   : > { %v1489_v12 = vpop.eup %1488  ;;  %v1019_v32 = vmul.f32 1.442695, %v998_v43  ;;  %v1037_v11 = vmul.f32 1.442695, %v1007_v44  ;;  %1047 = vadd.xlane.f32.xlu0 %v1487_v51  ;;  %v2352_v47 = vsub.f32 %v2068_v0, %v2086_v8  ;;  %v867_v55 = vmul.f32 1.442695, %v2353_v54 }
 0x273   : > { %1043 = vadd.xlane.f32.xlu1 %v1489_v12  ;;  %v981_v31 = vpop.permute.xlu1 %980  ;;  %v865_v7 = vmul.f32 1.442695, %v2348_v26  ;;  %v857_v62 = vmul.f32 1.442695, %v2354_v56  ;;  %v2355_v0 = vsub.f32 %v2116_v24, %v2134_v34  ;;  %v2356_v19 = vsub.f32 %v2113_v23, %v2131_v33  ;;  %v881_v44 = vld [vmem:[%s1786_s16] sm:$0xff]  ;;  %v888_v54 = vld [vmem:[%s1786_s16 + $0x38] sm:$0xff] }
 0x274   : > { %1502 = vpow2.f32 %v1019_v32  ;;  %v1006_v13 = vsub.f32 %v1996_v39, %v981_v31  ;;  %v861_v53 = vmul.f32 1.442695, %v2352_v47  ;;  %v2357_v34 = vsub.f32 %v2140_v38, %v2158_v60 }
 0x275   : > { %v1491_v14 = vpop.eup %1490  ;;  %1504 = vpow2.f32 %v1037_v11  ;;  %v863_v8 = vmul.f32 1.442695, %v2355_v0  ;;  %v873_v43 = vmul.f32 1.442695, %v2356_v19  ;;  %v889_v11 = vld [vmem:[%s1786_s16 + $0x40] sm:$0xff] }
 0x276   : > { %v1493_v25 = vpop.eup %1492  ;;  %v1035_v28 = vmul.f32 1.442695, %v1006_v13  ;;  %1063 = vadd.xlane.f32.xlu0 %v1491_v14  ;;  %v859_v31 = vmul.f32 1.442695, %v2357_v34  ;;  %v2358_v13 = vsub.f32 %v2137_v37, %v2155_v59 }
 0x277   : > { %1053 = vadd.xlane.f32.xlu1 %v1493_v25  ;;  %v991_v36 = vpop.permute.xlu1 %990 }
 0x278   : > { %1506 = vpow2.f32 %v1035_v28  ;;  %v1008_v35 = vsub.f32 %v2001_v40, %v991_v36  ;;  %v853_v40 = vmul.f32 1.442695, %v835_v50  ;;  %v871_v50 = vmul.f32 1.442695, %v2351_v48  ;;  %v884_v36 = vld [vmem:[%s1786_s16 + $0x18] sm:$0xff]  ;;  %v885_v48 = vld [vmem:[%s1786_s16 + $0x20] sm:$0xff] }
 0x279   : > { %v1495_v16 = vpop.eup %1494  ;;  %v877_v14 = vmul.f32 1.442695, %v2358_v13 }
 0x27a   : > { %v1497_v17 = vpop.eup %1496  ;;  %v1039_v57 = vmul.f32 1.442695, %v1008_v35  ;;  %1059 = vadd.xlane.f32.xlu0 %v1495_v16  ;;  %v882_v16 = vld [vmem:[%s1786_s16 + $0x8] sm:$0xff] }
 0x27b   : > { %1049 = vadd.xlane.f32.xlu1 %v1497_v17 }
 0x27c   : > { %1508 = vpow2.f32 %v1039_v57  ;;  %v2359_v57 = vsub.f32 %v2161_v3, %v2176_v29  ;;  %v2360_v29 = vsub.f32 %v2179_v30, %v2188_v5 }
 0x27d   : > { %v1499_v49 = vpop.eup %1498  ;;  %1510 = vpow2.f32 %v853_v40 }
 0x27e   : > { %v1501_v58 = vpop.eup %1500  ;;  %1055 = vadd.xlane.f32.xlu0 %v1499_v49  ;;  %1512 = vpow2.f32 %v869_v15  ;;  %v875_v49 = vmul.f32 1.442695, %v2359_v57  ;;  %v879_v15 = vmul.f32 1.442695, %v2360_v29 }
 0x27f   : > { %1065 = vadd.xlane.f32.xlu1 %v1501_v58  ;;  %1514 = vpow2.f32 %v849_v52 }
 0x280   : > { %1516 = vpow2.f32 %v865_v7 }
 0x281   : > { %v1503_v39 = vpop.eup %1502  ;;  %1518 = vpow2.f32 %v855_v46 }
 0x282   : > { %v1505_v1 = vpop.eup %1504  ;;  %1051 = vadd.xlane.f32.xlu0 %v1503_v39  ;;  %1520 = vpow2.f32 %v851_v45 }
 0x283   : > { %1069 = vadd.xlane.f32.xlu1 %v1505_v1  ;;  %1522 = vpow2.f32 %v871_v50  ;;  %v892_v1 = vld [vmem:[%s1786_s16 + $0x58] sm:$0xff] }
 0x284   : > { %1524 = vpow2.f32 %v861_v53 }
 0x285   : > { %v1507_v21 = vpop.eup %1506  ;;  %1526 = vpow2.f32 %v867_v55 }
 0x286   : > { %1067 = vadd.xlane.f32.xlu0 %v1507_v21  ;;  %1528 = vpow2.f32 %v857_v62  ;;  %v893_v62 = vld [vmem:[%s1786_s16 + $0x60] sm:$0xff] }
 0x287   : > { %1530 = vpow2.f32 %v863_v8 }
 0x288   : > { %1532 = vpow2.f32 %v873_v43 }
 0x289   : > { %v1509_v2 = vpop.eup %1508  ;;  %1534 = vpow2.f32 %v859_v31 }
 0x28a   : > { %1071 = vadd.xlane.f32.xlu0 %v1509_v2  ;;  %v1511_v61 = vpop.eup %1510  ;;  %1536 = vpow2.f32 %v877_v14  ;;  %v896_v14 = vld [vmem:[%s1786_s16 + $0x78] sm:$0xff] }
 0x28b   : > { %v1513_v6 = vpop.eup %1512  ;;  %v899_v4 = vmul.f32 %v1511_v61, %v883_v63  ;;  %1538 = vpow2.f32 %v875_v49 }
 0x28c   : > { %v1515_v9 = vpop.eup %1514  ;;  %v907_v10 = vmul.f32 %v1513_v6, %v891_v27  ;;  %1540 = vpow2.f32 %v879_v15 }
 0x28d   : > { %v1517_v51 = vpop.eup %1516  ;;  %v897_v23 = vmul.f32 %v1515_v9, %v881_v44 }
 0x28e   : > { %v1519_v33 = vpop.eup %1518  ;;  %v905_v25 = vmul.f32 %v1517_v51, %v889_v11  ;;  %v894_v11 = vld [vmem:[%s1786_s16 + $0x68] sm:$0xff] }
 0x28f   : > { %v1521_v35 = vpop.eup %1520  ;;  %v900_v37 = vmul.f32 %v1519_v33, %v884_v36 }
 0x290   : > { %v1523_v59 = vpop.eup %1522  ;;  %v898_v58 = vmul.f32 %v1521_v35, %v882_v16 }
 0x291   : > { %v1525_v21 = vpop.eup %1524  ;;  %v908_v18 = vmul.f32 %v1523_v59, %v892_v1 }
 0x292   : > { %v1527_v52 = vpop.eup %1526  ;;  %v903_v26 = vmul.f32 %v1525_v21, %v887_v22 }
 0x293   : > { %v1529_v46 = vpop.eup %1528  ;;  %v906_v5 = vmul.f32 %v1527_v52, %v890_v42 }
 0x294   : > { %v1531_v30 = vpop.eup %1530  ;;  %v901_v47 = vmul.f32 %v1529_v46, %v885_v48 }
 0x295   : > { %v1533_v55 = vpop.eup %1532  ;;  %v904_v6 = vmul.f32 %v1531_v30, %v888_v54 }
 0x296   : > { %v1535_v27 = vpop.eup %1534  ;;  %v909_v0 = vmul.f32 %v1533_v55, %v893_v62 }
 0x297   : > { %v1537_v9 = vpop.eup %1536 }
 0x298   : > { %v1539_v51 = vpop.eup %1538 }
 0x299   : > { %v1541_v33 = vpop.eup %1540 }
 0x2f3   : > { %v1046_v20 = vpop.xlane.xlu0 %1045 }
 0x2f4   : > { %v1062_v12 = vpop.xlane.xlu1 %1061  ;;  %v1075_v32 = vadd.f32 %v1046_v20, %v899_v4  ;;  %v886_v4 = vld [vmem:[%s1786_s16 + $0x28] sm:$0xff] }
 0x2f5   : > { %v1083_v24 = vadd.f32 %v1062_v12, %v907_v10  ;;  %v895_v10 = vld [vmem:[%s1786_s16 + $0x70] sm:$0xff]  ;;  %v902_v44 = vmul.f32 %v1535_v27, %v886_v4 }
 0x2f6   : > { %1092 = vst.msk [vmem:[%s1786_s16 + $0x10] sm:$0xff] %vm1089_vm5, %v1075_v32  ;;  %v911_v12 = vmul.f32 %v1537_v9, %v895_v10 }
 0x2f7   : > { %1100 = vst.msk [vmem:[%s1786_s16 + $0x50] sm:$0xff] %vm1089_vm5, %v1083_v24  ;;  %v1042_v28 = vpop.xlane.xlu0 %1041 }
 0x2f8   : > { %v1058_v38 = vpop.xlane.xlu1 %1057  ;;  %v1073_v60 = vadd.f32 %v1042_v28, %v897_v23  ;;  %v910_v23 = vmul.f32 %v1539_v51, %v894_v11  ;;  %v912_v28 = vmul.f32 %v1541_v33, %v896_v14 }
 0x2f9   : > { %v1081_v17 = vadd.f32 %v1058_v38, %v905_v25 }
 0x2fa   : > { %1090 = vst.msk [vmem:[%s1786_s16] sm:$0xff] %vm1089_vm5, %v1073_v60 }
 0x2fb   : > { %1098 = vst.msk [vmem:[%s1786_s16 + $0x40] sm:$0xff] %vm1089_vm5, %v1081_v17  ;;  %v1048_v39 = vpop.xlane.xlu0 %1047 }
 0x2fc   : > { %v1044_v2 = vpop.xlane.xlu1 %1043  ;;  %v1076_v40 = vadd.f32 %v1048_v39, %v900_v37 }
 0x2fd   : > { %v1074_v3 = vadd.f32 %v1044_v2, %v898_v58 }
 0x2fe   : > { %1093 = vst.msk [vmem:[%s1786_s16 + $0x18] sm:$0xff] %vm1089_vm5, %v1076_v40 }
 0x2ff   : > { %1091 = vst.msk [vmem:[%s1786_s16 + $0x8] sm:$0xff] %vm1089_vm5, %v1074_v3  ;;  %v1064_v7 = vpop.xlane.xlu0 %1063 }
 0x300   : > { %v1054_v41 = vpop.xlane.xlu1 %1053  ;;  %v1084_v45 = vadd.f32 %v1064_v7, %v908_v18 }
 0x301   : > { %v1079_v50 = vadd.f32 %v1054_v41, %v903_v26 }
 0x302   : > { %1101 = vst.msk [vmem:[%s1786_s16 + $0x58] sm:$0xff] %vm1089_vm5, %v1084_v45 }
 0x303   : > { %1096 = vst.msk [vmem:[%s1786_s16 + $0x30] sm:$0xff] %vm1089_vm5, %v1079_v50  ;;  %v1060_v53 = vpop.xlane.xlu0 %1059 }
 0x304   : > { %v1050_v61 = vpop.xlane.xlu1 %1049  ;;  %v1082_v56 = vadd.f32 %v1060_v53, %v906_v5 }
 0x305   : > { %v1077_v63 = vadd.f32 %v1050_v61, %v901_v47 }
 0x306   : > { %1099 = vst.msk [vmem:[%s1786_s16 + $0x48] sm:$0xff] %vm1089_vm5, %v1082_v56 }
 0x307   : > { %1094 = vst.msk [vmem:[%s1786_s16 + $0x20] sm:$0xff] %vm1089_vm5, %v1077_v63  ;;  %v1056_v8 = vpop.xlane.xlu0 %1055 }
 0x308   : > { %v1066_v19 = vpop.xlane.xlu1 %1065  ;;  %v1080_v43 = vadd.f32 %v1056_v8, %v904_v6 }
 0x309   : > { %v1085_v20 = vadd.f32 %v1066_v19, %v909_v0 }
 0x30a   : > { %1097 = vst.msk [vmem:[%s1786_s16 + $0x38] sm:$0xff] %vm1089_vm5, %v1080_v43 }
 0x30b   : > { %1102 = vst.msk [vmem:[%s1786_s16 + $0x60] sm:$0xff] %vm1089_vm5, %v1085_v20  ;;  %v1052_v32 = vpop.xlane.xlu0 %1051 }
 0x30c   : > { %v1070_v24 = vpop.xlane.xlu1 %1069  ;;  %v1078_v34 = vadd.f32 %v1052_v32, %v902_v44 }
 0x30d   : > { %v1087_v31 = vadd.f32 %v1070_v24, %v911_v12 }
 0x30e   : > { %1095 = vst.msk [vmem:[%s1786_s16 + $0x28] sm:$0xff] %vm1089_vm5, %v1078_v34 }
 0x30f   : > { %1104 = vst.msk [vmem:[%s1786_s16 + $0x70] sm:$0xff] %vm1089_vm5, %v1087_v31  ;;  %v1068_v13 = vpop.xlane.xlu0 %1067 }
 0x310   : > { %v1086_v25 = vadd.f32 %v1068_v13, %v910_v23 }
 0x312   : > { %1103 = vst.msk [vmem:[%s1786_s16 + $0x68] sm:$0xff] %vm1089_vm5, %v1086_v25 }
 0x313   : > { %v1072_v36 = vpop.xlane.xlu0 %1071 }
 0x314   : > { %v1088_v35 = vadd.f32 %v1072_v36, %v912_v28 }
 0x316   : > { %1105 = vst.msk [vmem:[%s1786_s16 + $0x78] sm:$0xff] %vm1089_vm5, %v1088_v35 }
 0x317 PF: > { %s19_s25 = sadd.s32 1, %s1636_s25   ;;  %s2361_s0 = sld [smem:[#allocation5_spill]] }
 0x318   : > { %p16_p12 = scmp.ge.s32.totalorder %s19_s25, 6   ;;  %s2362_s28 = sld [smem:[#allocation6_spill]] }
 0x319   : > { %s2363_s18 = smov %s1612_s19  ;;  %s2364_s19 = smov %s1616_s20 }
 0x31a   : > { %s2365_s20 = smov %s1739_s11  ;;  %s2366_s21 = smov %s1628_s23 }
 0x31b   : > { %s2367_s22 = smov %s1632_s24  ;;  %18 = sbr.rel (!%p16_p12) target bundleno = 7 (0x7), region = 101 }
 0x31d   : > { %s2368_s23 = smov %s2361_s0 }
 0x31e   : > { %s2369_s24 = smov %s2362_s28 }
 0x320   :  { %1159 = vsyncpa [#allocation3], 1 }
 0x321   :  { %1161 = vsyncpa [#allocation3 + $0x1], 1 }

</bundles_post_ra>
